<compile_context>
chip_gen: v6e
topology: v6e:2x2x1
jax: 0.10.0
libtpu: 0.0.40
codegen_flags: <defaults>
</compile_context>

<pallas_src>
import functools

import jax
import jax.numpy as jnp
from jax import lax
from jax.experimental import pallas as pl
from jax.experimental.pallas import tpu as pltpu

EPS = 1e-9          # matches BatchNorm1d(..., eps=1e-09)
_LANE = 128
_TILE_M_CAP = 1024  # batch-tile cap; per-row VMEM is ~4 KB so this always fits


def _vmem_limit_bytes() -> int:
    """Generation-aware scoped-VMEM limit (~75% of physical, capped)."""
    try:
        cap = pltpu.get_tpu_info().vmem_capacity_bytes
    except Exception:
        cap = 64 * 1024 * 1024  # conservative fallback (v7x-sized)
    return max(16 * 1024 * 1024, min((cap * 3) // 4, 96 * 1024 * 1024))


def _compiler_params(semantics):
    return pltpu.CompilerParams(
        dimension_semantics=semantics,
        vmem_limit_bytes=_vmem_limit_bytes(),
    )


def _round_up(n: int, m: int) -> int:
    return (n + m - 1) // m * m


def _pad_axis(a, target: int, axis: int):
    pad = target - a.shape[axis]
    if pad <= 0:
        return a
    widths = [(0, 0)] * a.ndim
    widths[axis] = (0, pad)
    return jnp.pad(a, widths)


def _pick_tile_m(m: int, cap: int = _TILE_M_CAP) -> int:
    """Batch tile: full extent if small, else a large multiple of 8 (padding ok)."""
    cap = max(8, (cap // 8) * 8)
    if m <= cap:
        return m
    for t in range(cap, max(cap // 2, 8) - 1, -8):   # prefer exact divisor
        if m % t == 0:
            return t
    return cap                                        # pad batch to multiple of cap


# ----------------------------------------------------------------------------
# Kernels
# ----------------------------------------------------------------------------
def _mlp_prelu_kernel(x_ref, w1_ref, b1_ref, a1_ref, w2_ref, b2_ref, a2_ref,
                      w3_ref, b3_ref, o_ref):
    """Fully fused fc1 -> PReLU -> fc2 -> PReLU -> fc3 for one batch tile."""
    h = jnp.dot(x_ref[...], w1_ref[...], preferred_element_type=jnp.float32)
    h = h + b1_ref[...]
    h = jnp.where(h > 0.0, h, a1_ref[...] * h)

    h = jnp.dot(h.astype(w2_ref.dtype), w2_ref[...],
                preferred_element_type=jnp.float32)
    h = h + b2_ref[...]
    h = jnp.where(h > 0.0, h, a2_ref[...] * h)

    o = jnp.dot(h.astype(w3_ref.dtype), w3_ref[...],
                preferred_element_type=jnp.float32)
    o_ref[...] = (o + b3_ref[...]).astype(o_ref.dtype)


def _fc_stats_kernel(x_ref, w_ref, b_ref, h_ref, stats_ref, *,
                     tm, n_valid, mask_rows):
    """h = x @ w + b; write h and accumulate per-feature sum / sumsq over batch."""
    i = pl.program_id(0)
    h = jnp.dot(x_ref[...], w_ref[...], preferred_element_type=jnp.float32)
    h = h + b_ref[...]
    if mask_rows:  # zero padded batch rows so they neither pollute stats nor h
        row = i * tm + lax.broadcasted_iota(jnp.int32, h.shape, 0)
        h = jnp.where(row < n_valid, h, 0.0)
    h_ref[...] = h

    @pl.when(i == 0)
    def _():
        stats_ref[...] = jnp.zeros_like(stats_ref)

    stats_ref[0:1, :] = stats_ref[0:1, :] + jnp.sum(h, axis=0, keepdims=True)
    stats_ref[1:2, :] = stats_ref[1:2, :] + jnp.sum(h * h, axis=0, keepdims=True)


def _dice_fc_stats_kernel(h_ref, mu_ref, rstd_ref, wd_ref, w_ref, b_ref,
                          o_ref, stats_ref, *, tm, n_valid, mask_rows):
    """Dice gate on h, then o = gate(h) @ w + b; accumulate stats of o."""
    i = pl.program_id(0)
    h = h_ref[...]
    prob = jax.nn.sigmoid((h - mu_ref[...]) * rstd_ref[...])
    wd = wd_ref[...]
    g = h * (wd + prob * (1.0 - wd))          # == prob*h + (1-prob)*h*wd

    o = jnp.dot(g.astype(w_ref.dtype), w_ref[...],
                preferred_element_type=jnp.float32)
    o = o + b_ref[...]
    if mask_rows:
        row = i * tm + lax.broadcasted_iota(jnp.int32, o.shape, 0)
        o = jnp.where(row < n_valid, o, 0.0)
    o_ref[...] = o

    @pl.when(i == 0)
    def _():
        stats_ref[...] = jnp.zeros_like(stats_ref)

    stats_ref[0:1, :] = stats_ref[0:1, :] + jnp.sum(o, axis=0, keepdims=True)
    stats_ref[1:2, :] = stats_ref[1:2, :] + jnp.sum(o * o, axis=0, keepdims=True)


def _dice_fc_kernel(h_ref, mu_ref, rstd_ref, wd_ref, w_ref, b_ref, o_ref):
    """Dice gate on h, then final fc into a lane-dense padded output slab."""
    h = h_ref[...]
    prob = jax.nn.sigmoid((h - mu_ref[...]) * rstd_ref[...])
    wd = wd_ref[...]
    g = h * (wd + prob * (1.0 - wd))
    o = jnp.dot(g.astype(w_ref.dtype), w_ref[...],
                preferred_element_type=jnp.float32)
    o_ref[...] = (o + b_ref[...]).astype(o_ref.dtype)


def _stats_to_norm(stats, n):
    """Batch-mean and rsqrt(biased-var + eps) from resident (2, C) sum/sumsq."""
    mean = stats[0:1, :] / n
    var = jnp.maximum(stats[1:2, :] / n - mean * mean, 0.0)
    return mean, lax.rsqrt(var + EPS)


# ----------------------------------------------------------------------------
# Forward wrapper
# ----------------------------------------------------------------------------
def mlp_forward(x, params, activation="PReLU", tile_m=None):
    m, k = x.shape
    h1 = params["w1"].shape[1]
    h2 = params["w2"].shape[1]
    n_out = params["w3"].shape[1]
    h1p, h2p, n_outp = (_round_up(d, _LANE) for d in (h1, h2, n_out))

    tm = _pick_tile_m(m) if tile_m is None else max(8, (tile_m // 8) * 8)
    m_pad = _round_up(m, tm)
    grid = (m_pad // tm,)
    mask_rows = m_pad != m

    xb = x.astype(jnp.bfloat16)
    if mask_rows:
        xb = _pad_axis(xb, m_pad, 0)          # zero rows -> deterministic padding

    # Zero-pad feature dims to 128 multiples (lane-dense stores); padded
    # channels stay exactly 0 through every layer.
    w1 = _pad_axis(params["w1"], h1p, 1).astype(jnp.bfloat16)
    b1 = _pad_axis(params["b1"].reshape(1, -1), h1p, 1).astype(jnp.float32)
    w2 = _pad_axis(_pad_axis(params["w2"], h1p, 0), h2p, 1).astype(jnp.bfloat16)
    b2 = _pad_axis(params["b2"].reshape(1, -1), h2p, 1).astype(jnp.float32)
    w3 = _pad_axis(_pad_axis(params["w3"], h2p, 0), n_outp, 1).astype(jnp.bfloat16)
    b3 = _pad_axis(params["b3"].reshape(1, -1), n_outp, 1).astype(jnp.float32)

    if activation == "PReLU":
        a1 = _pad_axis(params["a1"].reshape(1, -1), h1p, 1).astype(jnp.float32)
        a2 = _pad_axis(params["a2"].reshape(1, -1), h2p, 1).astype(jnp.float32)
        out = pl.pallas_call(
            _mlp_prelu_kernel,
            out_shape=jax.ShapeDtypeStruct((m_pad, n_outp), jnp.float32),
            grid=grid,
            in_specs=[
                pl.BlockSpec((tm, k), lambda i: (i, 0)),        # x batch tile
                pl.BlockSpec((k, h1p), lambda i: (0, 0)),        # resident params
                pl.BlockSpec((1, h1p), lambda i: (0, 0)),
                pl.BlockSpec((1, h1p), lambda i: (0, 0)),
                pl.BlockSpec((h1p, h2p), lambda i: (0, 0)),
                pl.BlockSpec((1, h2p), lambda i: (0, 0)),
                pl.BlockSpec((1, h2p), lambda i: (0, 0)),
                pl.BlockSpec((h2p, n_outp), lambda i: (0, 0)),
                pl.BlockSpec((1, n_outp), lambda i: (0, 0)),
            ],
            out_specs=pl.BlockSpec((tm, n_outp), lambda i: (i, 0)),
            compiler_params=_compiler_params(("parallel",)),
        )(xb, w1, b1, a1, w2, b2, a2, w3, b3)
        return out[:m, :n_out]

    if activation == "Dice":
        wd1 = _pad_axis(params["d1"].reshape(1, -1), h1p, 1).astype(jnp.float32)
        wd2 = _pad_axis(params["d2"].reshape(1, -1), h2p, 1).astype(jnp.float32)

        # Pass A: h1 = x @ w1 + b1, with resident per-feature sum/sumsq.
        h1_arr, stats1 = pl.pallas_call(
            functools.partial(_fc_stats_kernel, tm=tm, n_valid=m,
                              mask_rows=mask_rows),
            out_shape=(jax.ShapeDtypeStruct((m_pad, h1p), jnp.float32),
                       jax.ShapeDtypeStruct((2, h1p), jnp.float32)),
            grid=grid,
            in_specs=[
                pl.BlockSpec((tm, k), lambda i: (i, 0)),
                pl.BlockSpec((k, h1p), lambda i: (0, 0)),
                pl.BlockSpec((1, h1p), lambda i: (0, 0)),
            ],
            out_specs=(pl.BlockSpec((tm, h1p), lambda i: (i, 0)),
                       pl.BlockSpec((2, h1p), lambda i: (0, 0))),
            compiler_params=_compiler_params(("arbitrary",)),
        )(xb, w1, b1)
        mu1, rstd1 = _stats_to_norm(stats1, m)

        # Pass B: Dice gate on h1, then h2 = gate(h1) @ w2 + b2 (+ stats of h2).
        h2_arr, stats2 = pl.pallas_call(
            functools.partial(_dice_fc_stats_kernel, tm=tm, n_valid=m,
                              mask_rows=mask_rows),
            out_shape=(jax.ShapeDtypeStruct((m_pad, h2p), jnp.float32),
                       jax.ShapeDtypeStruct((2, h2p), jnp.float32)),
            grid=grid,
            in_specs=[
                pl.BlockSpec((tm, h1p), lambda i: (i, 0)),
                pl.BlockSpec((1, h1p), lambda i: (0, 0)),
                pl.BlockSpec((1, h1p), lambda i: (0, 0)),
                pl.BlockSpec((1, h1p), lambda i: (0, 0)),
                pl.BlockSpec((h1p, h2p), lambda i: (0, 0)),
                pl.BlockSpec((1, h2p), lambda i: (0, 0)),
            ],
            out_specs=(pl.BlockSpec((tm, h2p), lambda i: (i, 0)),
                       pl.BlockSpec((2, h2p), lambda i: (0, 0))),
            compiler_params=_compiler_params(("arbitrary",)),
        )(h1_arr, mu1, rstd1, wd1, w2, b2)
        mu2, rstd2 = _stats_to_norm(stats2, m)

        # Pass C: Dice gate on h2, final fc3 into a 128-wide lane-dense slab.
        out = pl.pallas_call(
            _dice_fc_kernel,
            out_shape=jax.ShapeDtypeStruct((m_pad, n_outp), jnp.float32),
            grid=grid,
            in_specs=[
                pl.BlockSpec((tm, h2p), lambda i: (i, 0)),
                pl.BlockSpec((1, h2p), lambda i: (0, 0)),
                pl.BlockSpec((1, h2p), lambda i: (0, 0)),
                pl.BlockSpec((1, h2p), lambda i: (0, 0)),
                pl.BlockSpec((h2p, n_outp), lambda i: (0, 0)),
                pl.BlockSpec((1, n_outp), lambda i: (0, 0)),
            ],
            out_specs=pl.BlockSpec((tm, n_outp), lambda i: (i, 0)),
            compiler_params=_compiler_params(("parallel",)),
        )(h2_arr, mu2, rstd2, wd2, w3, b3)
        return out[:m, :n_out]

    raise ValueError(f"Unrecognized activation: {activation}")


# ----------------------------------------------------------------------------
# Pure-JAX references (PyTorch semantics) and parameter init
# ----------------------------------------------------------------------------
def _linear_ref(x, w, b, alpha=None):
    y = jnp.dot(x, w, precision=lax.Precision.HIGHEST) + b[None, :]
    if alpha is not None:
        y = jnp.where(y > 0.0, y, alpha[None, :] * y)
    return y


def dice_ref(x, weight):
    mean = jnp.mean(x, axis=0, keepdims=True)
    var = jnp.mean((x - mean) ** 2, axis=0, keepdims=True)
    prob = jax.nn.sigmoid((x - mean) / jnp.sqrt(var + EPS))
    return prob * x + (1.0 - prob) * x * weight[None, :]


def mlp_ref(x, params, activation="PReLU"):
    if activation == "PReLU":
        h = _linear_ref(x, params["w1"], params["b1"], params["a1"])
        h = _linear_ref(h, params["w2"], params["b2"], params["a2"])
    else:
        h = dice_ref(_linear_ref(x, params["w1"], params["b1"]), params["d1"])
        h = dice_ref(_linear_ref(h, params["w2"], params["b2"]), params["d2"])
    return _linear_ref(h, params["w3"], params["b3"])


def init_mlp_params(key, embedding_dim, hidden=(200, 80)):
    input_size = embedding_dim * 9
    ks = jax.random.split(key, 6)

    def lin(kw, kb, fan_in, fan_out):
        bound = fan_in ** -0.5
        w = jax.random.uniform(kw, (fan_in, fan_out), jnp.float32, -bound, bound)
        b = jax.random.uniform(kb, (fan_out,), jnp.float32, -bound, bound)
        return w, b

    w1, b1 = lin(ks[0], ks[1], input_size, hidden[0])
    w2, b2 = lin(ks[2], ks[3], hidden[0], hidden[1])
    w3, b3 = lin(ks[4], ks[5], hidden[1], 2)
    return {
        "w1": w1, "b1": b1, "w2": w2, "b2": b2, "w3": w3, "b3": b3,
        "a1": jnp.full((hidden[0],), 0.25, jnp.float32),   # nn.PReLU init
        "a2": jnp.full((hidden[1],), 0.25, jnp.float32),
        "d1": jnp.full((hidden[0],), 0.25, jnp.float32),   # Dice weight init
        "d2": jnp.full((hidden[1],), 0.25, jnp.float32),
    }


if __name__ == "__main__":
    key = jax.random.PRNGKey(0)
    kx, kp, kx2 = jax.random.split(key, 3)

    embedding_dim = 8                       # input_size = embedding_dim * 9 = 72
    hidden = (200, 80)
    params = init_mlp_params(kp, embedding_dim, hidden)

    # Small batch: single batch-tile path (full-extent blocks).
    x = jax.random.normal(kx, (64, embedding_dim * 9), dtype=jnp.float32)
    for activation in ("PReLU", "Dice"):
        out = jax.block_until_ready(mlp_forward(x, params, activation))
        ref = mlp_ref(x, params, activation)
        assert out.shape == (64, 2)
        # Tolerance covers bf16 MXU inputs vs HIGHEST-precision f32 reference.
        assert jnp.allclose(out, ref, atol=3e-2, rtol=3e-2), activation

    # Non-divisible batch with a forced small tile: multi-tile grid + padded-row
    # masking for the Dice batch-statistics accumulators.
    x2 = jax.random.normal(kx2, (200, embedding_dim * 9), dtype=jnp.float32)
    for activation in ("PReLU", "Dice"):
        out = jax.block_until_ready(mlp_forward(x2, params, activation, tile_m=128))
        ref = mlp_ref(x2, params, activation)
        assert out.shape == (200, 2)
        assert jnp.allclose(out, ref, atol=3e-2, rtol=3e-2), activation

    print("KERNEL_OK")
</pallas_src>

<mosaic_0001>
module attributes {stable_mosaic.version = 11 : i64} {
  func.func @_mlp_prelu_kernel(%arg0: i32, %arg1: memref<64x72xbf16, #tpu.memory_space<vmem>>, %arg2: memref<72x256xbf16, #tpu.memory_space<vmem>>, %arg3: memref<1x256xf32, #tpu.memory_space<vmem>>, %arg4: memref<1x256xf32, #tpu.memory_space<vmem>>, %arg5: memref<256x128xbf16, #tpu.memory_space<vmem>>, %arg6: memref<1x128xf32, #tpu.memory_space<vmem>>, %arg7: memref<1x128xf32, #tpu.memory_space<vmem>>, %arg8: memref<128x128xbf16, #tpu.memory_space<vmem>>, %arg9: memref<1x128xf32, #tpu.memory_space<vmem>>, %arg10: memref<64x128xf32, #tpu.memory_space<vmem>>) attributes {dimension_semantics = [#tpu.dimension_semantics<parallel>], iteration_bounds = array<i64: 1>, scalar_prefetch = 0 : i64, scratch_operands = 0 : i64, tpu.core_type = #tpu.core_type<tc>, window_params = [{transform_indices = @transform_0, window_bounds = array<i64: 64, 72>}, {pipeline_mode = #tpu.pipeline_mode<synchronous>, transform_indices = @transform_1, window_bounds = array<i64: 72, 256>}, {pipeline_mode = #tpu.pipeline_mode<synchronous>, transform_indices = @transform_2, window_bounds = array<i64: 1, 256>}, {pipeline_mode = #tpu.pipeline_mode<synchronous>, transform_indices = @transform_3, window_bounds = array<i64: 1, 256>}, {pipeline_mode = #tpu.pipeline_mode<synchronous>, transform_indices = @transform_4, window_bounds = array<i64: 256, 128>}, {pipeline_mode = #tpu.pipeline_mode<synchronous>, transform_indices = @transform_5, window_bounds = array<i64: 1, 128>}, {pipeline_mode = #tpu.pipeline_mode<synchronous>, transform_indices = @transform_6, window_bounds = array<i64: 1, 128>}, {pipeline_mode = #tpu.pipeline_mode<synchronous>, transform_indices = @transform_7, window_bounds = array<i64: 128, 128>}, {pipeline_mode = #tpu.pipeline_mode<synchronous>, transform_indices = @transform_8, window_bounds = array<i64: 1, 128>}, {transform_indices = @transform_9, window_bounds = array<i64: 64, 128>}]} {
    %c0 = arith.constant 0 : index
    %c0_0 = arith.constant 0 : index
    %0 = vector.load %arg1[%c0, %c0_0] : memref<64x72xbf16, #tpu.memory_space<vmem>>, vector<64x72xbf16>
    %c0_1 = arith.constant 0 : index
    %c0_2 = arith.constant 0 : index
    %1 = vector.load %arg2[%c0_1, %c0_2] : memref<72x256xbf16, #tpu.memory_space<vmem>>, vector<72x256xbf16>
    %cst = arith.constant dense<0.000000e+00> : vector<64x256xf32>
    %2 = tpu.matmul %0, %1, %cst {dimension_numbers = #tpu.dot_dimension_numbers<[1], [0], [0], [1], [0, 0, 1, 1], [], []>} : vector<64x72xbf16>, vector<72x256xbf16>, vector<64x256xf32> -> vector<64x256xf32>
    %c0_3 = arith.constant 0 : index
    %c0_4 = arith.constant 0 : index
    %3 = vector.load %arg3[%c0_3, %c0_4] : memref<1x256xf32, #tpu.memory_space<vmem>>, vector<1x256xf32>
    %4 = vector.broadcast %3 : vector<1x256xf32> to vector<64x256xf32>
    %5 = arith.addf %2, %4 : vector<64x256xf32>
    %cst_5 = arith.constant 0.000000e+00 : f32
    %6 = vector.broadcast %cst_5 : f32 to vector<64x256xf32>
    %7 = arith.cmpf ogt, %5, %6 : vector<64x256xf32>
    %c0_6 = arith.constant 0 : index
    %c0_7 = arith.constant 0 : index
    %8 = vector.load %arg4[%c0_6, %c0_7] : memref<1x256xf32, #tpu.memory_space<vmem>>, vector<1x256xf32>
    %9 = vector.broadcast %8 : vector<1x256xf32> to vector<64x256xf32>
    %10 = arith.mulf %9, %5 : vector<64x256xf32>
    %11 = arith.select %7, %5, %10 : vector<64x256xi1>, vector<64x256xf32>
    %12 = arith.truncf %11 : vector<64x256xf32> to vector<64x256xbf16>
    %c0_8 = arith.constant 0 : index
    %c0_9 = arith.constant 0 : index
    %13 = vector.load %arg5[%c0_8, %c0_9] : memref<256x128xbf16, #tpu.memory_space<vmem>>, vector<256x128xbf16>
    %cst_10 = arith.constant dense<0.000000e+00> : vector<64x128xf32>
    %14 = tpu.matmul %12, %13, %cst_10 {dimension_numbers = #tpu.dot_dimension_numbers<[1], [0], [0], [1], [0, 0, 1, 1], [], []>} : vector<64x256xbf16>, vector<256x128xbf16>, vector<64x128xf32> -> vector<64x128xf32>
    %c0_11 = arith.constant 0 : index
    %c0_12 = arith.constant 0 : index
    %15 = vector.load %arg6[%c0_11, %c0_12] : memref<1x128xf32, #tpu.memory_space<vmem>>, vector<1x128xf32>
    %16 = vector.broadcast %15 : vector<1x128xf32> to vector<64x128xf32>
    %17 = arith.addf %14, %16 : vector<64x128xf32>
    %cst_13 = arith.constant 0.000000e+00 : f32
    %18 = vector.broadcast %cst_13 : f32 to vector<64x128xf32>
    %19 = arith.cmpf ogt, %17, %18 : vector<64x128xf32>
    %c0_14 = arith.constant 0 : index
    %c0_15 = arith.constant 0 : index
    %20 = vector.load %arg7[%c0_14, %c0_15] : memref<1x128xf32, #tpu.memory_space<vmem>>, vector<1x128xf32>
    %21 = vector.broadcast %20 : vector<1x128xf32> to vector<64x128xf32>
    %22 = arith.mulf %21, %17 : vector<64x128xf32>
    %23 = arith.select %19, %17, %22 : vector<64x128xi1>, vector<64x128xf32>
    %24 = arith.truncf %23 : vector<64x128xf32> to vector<64x128xbf16>
    %c0_16 = arith.constant 0 : index
    %c0_17 = arith.constant 0 : index
    %25 = vector.load %arg8[%c0_16, %c0_17] : memref<128x128xbf16, #tpu.memory_space<vmem>>, vector<128x128xbf16>
    %cst_18 = arith.constant dense<0.000000e+00> : vector<64x128xf32>
    %26 = tpu.matmul %24, %25, %cst_18 {dimension_numbers = #tpu.dot_dimension_numbers<[1], [0], [0], [1], [0, 0, 1, 1], [], []>} : vector<64x128xbf16>, vector<128x128xbf16>, vector<64x128xf32> -> vector<64x128xf32>
    %c0_19 = arith.constant 0 : index
    %c0_20 = arith.constant 0 : index
    %27 = vector.load %arg9[%c0_19, %c0_20] : memref<1x128xf32, #tpu.memory_space<vmem>>, vector<1x128xf32>
    %28 = vector.broadcast %27 : vector<1x128xf32> to vector<64x128xf32>
    %29 = arith.addf %26, %28 : vector<64x128xf32>
    %c0_21 = arith.constant 0 : index
    %c0_22 = arith.constant 0 : index
    %30 = vector.load %arg10[%c0_21, %c0_22] : memref<64x128xf32, #tpu.memory_space<vmem>>, vector<64x128xf32>
    tpu.vector_store %arg10[%c0_21, %c0_22], %29 {strides = array<i32>} : memref<64x128xf32, #tpu.memory_space<vmem>>, vector<64x128xf32>,
    return
  }
  func.func @transform_0(%arg0: i32) -> (i32, i32) {
    %c0_i32 = arith.constant 0 : i32
    %c0_i32_0 = arith.constant 0 : i32
    return %arg0, %c0_i32 : i32, i32
  }
  func.func @transform_1(%arg0: i32) -> (i32, i32) {
    %c0_i32 = arith.constant 0 : i32
    %c0_i32_0 = arith.constant 0 : i32
    %c0_i32_1 = arith.constant 0 : i32
    return %c0_i32, %c0_i32_0 : i32, i32
  }
  func.func @transform_2(%arg0: i32) -> (i32, i32) {
    %c0_i32 = arith.constant 0 : i32
    %c0_i32_0 = arith.constant 0 : i32
    %c0_i32_1 = arith.constant 0 : i32
    return %c0_i32, %c0_i32_0 : i32, i32
  }
  func.func @transform_3(%arg0: i32) -> (i32, i32) {
    %c0_i32 = arith.constant 0 : i32
    %c0_i32_0 = arith.constant 0 : i32
    %c0_i32_1 = arith.constant 0 : i32
    return %c0_i32, %c0_i32_0 : i32, i32
  }
  func.func @transform_4(%arg0: i32) -> (i32, i32) {
    %c0_i32 = arith.constant 0 : i32
    %c0_i32_0 = arith.constant 0 : i32
    %c0_i32_1 = arith.constant 0 : i32
    return %c0_i32, %c0_i32_0 : i32, i32
  }
  func.func @transform_5(%arg0: i32) -> (i32, i32) {
    %c0_i32 = arith.constant 0 : i32
    %c0_i32_0 = arith.constant 0 : i32
    %c0_i32_1 = arith.constant 0 : i32
    return %c0_i32, %c0_i32_0 : i32, i32
  }
  func.func @transform_6(%arg0: i32) -> (i32, i32) {
    %c0_i32 = arith.constant 0 : i32
    %c0_i32_0 = arith.constant 0 : i32
    %c0_i32_1 = arith.constant 0 : i32
    return %c0_i32, %c0_i32_0 : i32, i32
  }
  func.func @transform_7(%arg0: i32) -> (i32, i32) {
    %c0_i32 = arith.constant 0 : i32
    %c0_i32_0 = arith.constant 0 : i32
    %c0_i32_1 = arith.constant 0 : i32
    return %c0_i32, %c0_i32_0 : i32, i32
  }
  func.func @transform_8(%arg0: i32) -> (i32, i32) {
    %c0_i32 = arith.constant 0 : i32
    %c0_i32_0 = arith.constant 0 : i32
    %c0_i32_1 = arith.constant 0 : i32
    return %c0_i32, %c0_i32_0 : i32, i32
  }
  func.func @transform_9(%arg0: i32) -> (i32, i32) {
    %c0_i32 = arith.constant 0 : i32
    %c0_i32_0 = arith.constant 0 : i32
    return %arg0, %c0_i32 : i32, i32
  }
}

</mosaic_0001>

<bundles_post_ra>
// kernel: tpu_custom_call.1
= control target key start
LH: loop header
LB: loop body
LE: loop exit
PB: predicated region body
PF: predicated region fallthrough
CT: control target
= control target key end

     0   :  { %14 = vsyncpa [#allocation3], 0  ;;  %s1164_s0 = inlined_call_operand.hbm [shape: bf16[64,72], index: 0, kind: input, shape index: {}]   ;;  %s1165_s1 = inlined_call_operand.hbm [shape: bf16[72,256], index: 1, kind: input, shape index: {}]   ;;  %s1166_s2 = inlined_call_operand.vmem [shape: f32[1,256], index: 2, kind: input, shape index: {}]   ;;  %s1167_s3 = inlined_call_operand.vmem [shape: f32[1,256], index: 3, kind: input, shape index: {}]   ;;  %s1168_s4 = inlined_call_operand.hbm [shape: bf16[256,128], index: 4, kind: input, shape index: {}]   ;;  %s1169_s5 = inlined_call_operand.vmem [shape: f32[1,128], index: 5, kind: input, shape index: {}]   ;;  %s1170_s6 = inlined_call_operand.vmem [shape: f32[1,128], index: 6, kind: input, shape index: {}]   ;;  %s1171_s7 = inlined_call_operand.hbm [shape: bf16[128,128], index: 7, kind: input, shape index: {}]   ;;  %s1172_s8 = inlined_call_operand.vmem [shape: f32[1,128], index: 8, kind: input, shape index: {}]   ;;  %s1173_s9 = inlined_call_operand.hbm [shape: f32[64,128], index: 9, kind: output, shape index: {}]  }
   0x1   :  { %15 = vsyncpa [#allocation6], 0 }
   0x2   :  { %16 = vsyncpa [#allocation9], 0 }
   0x3   :  { %17 = vsyncpa [#allocation4], 0  ;;  %s1024_s30 = smov [#allocation5]  }
   0x4   :  { %s35_s10 = sshll.u32 %s1024_s30, 4  ;;  %s36_s10 = int_to_ptr.vmem [resolvable:$true] %s35_s10 }
   0x5   :  { %s924_s11 = scalar_lea.vmem %s36_s10, 1152  ;;  %p929_p1 = scmp.lt.s32.totalorder %s36_s10, %s36_s10 }
   0x6   :  { %p925_p0 = scmp.ne.s32.totalorder %s36_s10, %s924_s11  ;;  %p930_p2 = scmp.lt.s32.totalorder %s924_s11, %s924_s11 }
   0x8   :  { %p931_p3 = por %p930_p2, %p929_p1 }
   0xa   :  { %p932_p4 = pnand %p931_p3, %p925_p0 }
   0xc   :  { %935 = shalt.err (!%p932_p4)
}
   0xd   :  { %s1025_s12 = smov 128   ;;  %s1026_s13 = smov 8  }
   0xe   :  { %41 = dma.hbm_to_vmem [thread:$0]  %s1165_s1, 1152, %s36_s10, [#allocation6], %s1025_s12, %s1025_s12, %s1026_s13  }
   0xf   :  { %s1027_s16 = smov [#allocation2]  }
  0x10   :  { %s23_s17 = sshll.u32 %s1027_s16, 4  ;;  %s24_s17 = int_to_ptr.vmem [resolvable:$true] %s23_s17 }
  0x11   :  { %s944_s18 = scalar_lea.vmem %s24_s17, 512  ;;  %p949_p6 = scmp.lt.s32.totalorder %s24_s17, %s24_s17 }
  0x12   :  { %p945_p5 = scmp.ne.s32.totalorder %s24_s17, %s944_s18  ;;  %p950_p7 = scmp.lt.s32.totalorder %s944_s18, %s944_s18 }
  0x14   :  { %p951_p8 = por %p950_p7, %p949_p6 }
  0x16   :  { %p952_p9 = pnand %p951_p8, %p945_p5 }
  0x18   :  { %955 = shalt.err (!%p952_p9)
}
  0x19   :  { %s1028_s19 = smov 64   ;;  %s1029_s20 = smov 4  }
  0x1a   :  { %29 = dma.hbm_to_vmem [thread:$0]  %s1164_s0, 512, %s24_s17, [#allocation3], %s1028_s19, %s1028_s19, %s1029_s20  }
  0x1b   :  { %s1030_s23 = smov [#allocation7]   ;;  %s1031_s25 = smov [#allocation8]  }
  0x1c   :  { %s51_s24 = sshll.u32 %s1030_s23, 4  ;;  %s67_s1 = sshll.u32 %s1031_s25, 4  ;;  %s52_s24 = int_to_ptr.vmem [resolvable:$true] %s51_s24  ;;  %s68_s1 = int_to_ptr.vmem [resolvable:$true] %s67_s1 }
  0x1d   :  { %s964_s26 = scalar_lea.vmem %s52_s24, 2048  ;;  %p969_p11 = scmp.lt.s32.totalorder %s52_s24, %s52_s24 }
  0x1e   :  { %p965_p10 = scmp.ne.s32.totalorder %s52_s24, %s964_s26  ;;  %p970_p12 = scmp.lt.s32.totalorder %s964_s26, %s964_s26 }
  0x20   :  { %p971_p13 = por %p970_p12, %p969_p11 }
  0x22   :  { %p972_p0 = pnand %p971_p13, %p965_p10 }
  0x24   :  { %975 = shalt.err (!%p972_p0)
}
  0x25   :  { %57 = dma.hbm_to_vmem [thread:$0]  %s1168_s4, 2048, %s52_s24, [#allocation6], %s1028_s19, %s1028_s19, %s1029_s20  }
  0x26   :  { %s984_s29 = scalar_lea.vmem %s68_s1, 1024  ;;  %p989_p2 = scmp.lt.s32.totalorder %s68_s1, %s68_s1 }
  0x27   :  { %p985_p1 = scmp.ne.s32.totalorder %s68_s1, %s984_s29  ;;  %p990_p3 = scmp.lt.s32.totalorder %s984_s29, %s984_s29 }
  0x29   :  { %p991_p4 = por %p990_p3, %p989_p2 }
  0x2b   :  { %p992_p5 = pnand %p991_p4, %p985_p1 }
  0x2d   :  { %995 = shalt.err (!%p992_p5)
}
  0x2e   :  { %73 = dma.hbm_to_vmem [thread:$0]  %s1171_s7, 1024, %s68_s1, [#allocation9], %s1028_s19, %s1028_s19, %s1029_s20  }
  0x2f   :  { %1016 = dma.done.wait [#allocation3], 512  }
  0x30   :  { %1017 = vsyncadd [#allocation3], 4294966784 }
  0x31   :  { %1018 = dma.done.wait [#allocation6], 3200  }
  0x32   :  { %1019 = vsyncadd [#allocation6], 4294964096 }
  0x33   :  { %1020 = dma.done.wait [#allocation9], 1024  }
  0x34   :  { %1021 = vsyncadd [#allocation9], 4294966272  ;;  %v1032_v0 = vmov 0   ;;  %v105_v1 = vld [vmem:[#allocation5 + $0x40] sm:$0xff]  ;;  %vm196_vm0 = vcmask 1043456   ;;  %v894_v14 = vld [vmem:[#allocation7 + $0x70] sm:$0xff]   ;;  %v108_v35 = vlaneseq }
  0x35   :  { %235 = vmatprep.mubr.bf16.mxu0 %v1032_v0  ;;  %v755_v2 = vcombine.high %v105_v1, %v105_v1  ;;  %v754_v3 = vcombine.low %v105_v1, %v105_v1  ;;  %v876_v4 = vld [vmem:[#allocation5 + $0x34] ss:$8 sps:$4 sm:$0xff]   ;;  %v878_v6 = vld [vmem:[#allocation5 + $0x30] ss:$8 sps:$4 sm:$0xff]   ;;  %v879_v7 = vld [vmem:[#allocation5 + $0x24] ss:$8 sps:$4 sm:$0xff]  }
  0x36   :  { %v881_v8 = vld [vmem:[#allocation5 + $0x20] ss:$8 sps:$4 sm:$0xff]   ;;  %v882_v9 = vld [vmem:[#allocation5 + $0x14] ss:$8 sps:$4 sm:$0xff]   ;;  %v884_v10 = vld [vmem:[#allocation5 + $0x10] ss:$8 sps:$4 sm:$0xff]  }
  0x37   :  { %756 = vmatprep.subr.msk.bf16.mxu0 %vm196_vm0, %v755_v2  ;;  %v198_v5 = vsel %vm196_vm0, %v754_v3, 0  ;;  %v892_v11 = vld [vmem:[#allocation7 + $0x78] sm:$0xff]   ;;  %v895_v15 = vld [vmem:[#allocation7 + $0x30] sm:$0xff]   ;;  %v896_v16 = vld [vmem:[#allocation7 + $0x68] sm:$0xff]   ;;  %vm183_vm1 = vcmask 588800   ;;  %v109_v36 = vshrl.u32 %v108_v35, 7 }
  0x38   :  { %210 = vmatpush1.bf16.msra.mxu0 %v198_v5  ;;  %v885_v12 = vld [vmem:[#allocation5 + $0x4] ss:$8 sps:$4 sm:$0xff]   ;;  %788 = vmatprep.subr.bf16.mxu1 %v892_v11  ;;  %v887_v17 = vld [vmem:[#allocation5] ss:$8 sps:$4 sm:$0xff]   ;;  %v897_v18 = vld [vmem:[#allocation7 + $0x28] sm:$0xff]   ;;  %s1033_s16 = smov [#allocation10]  }
  0x39   :  { %211 = vmatprep.subr.bf16.mxu0 %v876_v4  ;;  %v893_v13 = vld [vmem:[#allocation7 + $0x38] sm:$0xff]   ;;  %v898_v20 = vld [vmem:[#allocation7 + $0x60] sm:$0xff]   ;;  %v890_v24 = vld [vmem:[#allocation2 + $0x10] sm:$0xff]   ;;  %v114_v37 = vsub.s32 1, %v109_v36  ;;  %v110_v38 = vsub.s32 0, %v109_v36 }
  0x3a   :  { %789 = vmatpush3.bf16.msra.mxu1 %v893_v13  ;;  %v888_v19 = vld [vmem:[#allocation2] sm:$0xff]   ;;  %v899_v21 = vld [vmem:[#allocation7 + $0x20] sm:$0xff]   ;;  %v891_v25 = vld [vmem:[#allocation2 + $0x18] sm:$0xff]  }
  0x3b   :  { %790 = vmatprep.subr.bf16.mxu1 %v894_v14  ;;  %v900_v22 = vld [vmem:[#allocation7 + $0x58] sm:$0xff]   ;;  %v889_v23 = vld [vmem:[#allocation2 + $0x8] sm:$0xff]   ;;  %v902_v27 = vld [vmem:[#allocation7 + $0x50] sm:$0xff]  }
  0x3c   :  { %212 = vmatpush1.bf16.msra.mxu0 %v878_v6  ;;  %v901_v26 = vld [vmem:[#allocation7 + $0x18] sm:$0xff]   ;;  %v903_v28 = vld [vmem:[#allocation7 + $0x10] sm:$0xff]   ;;  %v904_v29 = vld [vmem:[#allocation7 + $0x48] sm:$0xff]  }
  0x3d   :  { %213 = vmatprep.subr.bf16.mxu0 %v879_v7  ;;  %v905_v30 = vld [vmem:[#allocation7 + $0x8] sm:$0xff]   ;;  %v906_v31 = vld [vmem:[#allocation7 + $0x40] sm:$0xff]   ;;  %v908_v33 = vld [vmem:[#allocation8 + $0x38] sm:$0xff]  }
  0x3e   :  { %791 = vmatpush3.bf16.msra.mxu1 %v895_v15  ;;  %v907_v32 = vld [vmem:[#allocation7] sm:$0xff]   ;;  %v909_v34 = vld [vmem:[#allocation8 + $0x30] sm:$0xff]   ;;  %v106_v39 = vld [vmem:[%s1166_s2] sm:$0x3] }
  0x3f   :  { %792 = vmatprep.subr.bf16.mxu1 %v896_v16  ;;  %v1106_v40 = vrot.slane %v106_v39, %v114_v37  ;;  %v1108_v41 = vrot.slane %v106_v39, %v110_v38  ;;  %v292_v43 = vld [vmem:[%s1167_s3] sm:$0x3] }
  0x40   :  { %214 = vmatpush1.bf16.msra.mxu0 %v881_v8  ;;  %v1114_v46 = vrot.slane %v292_v43, %v114_v37  ;;  %v1117_v48 = vrot.slane %v292_v43, %v110_v38 }
  0x41   :  { %215 = vmatprep.subr.bf16.mxu0 %v882_v9 }
  0x42   :  { %793 = vmatpush3.bf16.msra.mxu1 %v897_v18 }
  0x43   :  { %794 = vmatprep.subr.bf16.mxu1 %v898_v20 }
  0x44   :  { %216 = vmatpush1.bf16.msra.mxu0 %v884_v10 }
  0x45   :  { %217 = vmatprep.subr.bf16.mxu0 %v885_v12 }
  0x46   :  { %795 = vmatpush3.bf16.msra.mxu1 %v899_v21 }
  0x47   :  { %796 = vmatprep.subr.bf16.mxu1 %v900_v22 }
  0x48   :  { %218 = vmatpush1.bf16.msra.mxu0 %v887_v17 }
  0x49   :  { %840 = vmatprep.subr.bf16.mxu0 %v908_v33 }
  0x4a   :  { %797 = vmatpush3.bf16.msra.mxu1 %v901_v26 }
  0x4b   :  { %757 = vmatmul.mubr.msk.bf16.vlgmr.msra.gmra.mxu0 %vm183_vm1, %v888_v19  ;;  %798 = vmatprep.subr.bf16.mxu1 %v902_v27 }
  0x4c   :  { %245 = vmatprep.mubr.bf16.mxu0 %v1032_v0  ;;  %841 = vmatpush3.bf16.msra.mxu0 %v908_v33 }
  0x4d   :  { %842 = vmatprep.subr.bf16.mxu0 %v909_v34 }
  0x4e   :  { %799 = vmatpush3.bf16.msra.mxu1 %v903_v28 }
  0x4f   :  { %800 = vmatprep.subr.bf16.mxu1 %v904_v29 }
  0x50   :  { %843 = vmatpush3.bf16.msra.mxu0 %v909_v34 }
  0x52   :  { %801 = vmatpush3.bf16.msra.mxu1 %v905_v30 }
  0x53   :  { %758 = vmatmul.mubr.msk.bf16.gmra.mxu0 %vm183_vm1, %v889_v23  ;;  %802 = vmatprep.subr.bf16.mxu1 %v906_v31 }
  0x54   :  { %255 = vmatprep.mubr.bf16.mxu0 %v1032_v0 }
  0x56   :  { %803 = vmatpush3.bf16.msra.mxu1 %v907_v32 }
  0x5b   :  { %759 = vmatmul.mubr.msk.bf16.gmra.mxu0 %vm183_vm1, %v890_v24 }
  0x5c   :  { %265 = vmatprep.mubr.bf16.mxu0 %v1032_v0 }
  0x63   :  { %760 = vmatmul.mubr.msk.bf16.gmra.mxu0 %vm183_vm1, %v891_v25 }
 0x10b   :  { %v237_v42 = vpop.f32.mrf.mxu0 }
 0x10c   :  { %v238_v47 = vadd.f32 %v237_v42, %v1108_v41 }
 0x10d   :  { %v239_v44 = vpop.f32.mrf.mxu0 }
 0x10e   :  { %v240_v45 = vadd.f32 %v239_v44, %v1106_v40  ;;  %v304_v55 = vmul.f32 %v1117_v48, %v238_v47  ;;  %vm276_vm4 = vcmp.gt.f32.partialorder %v238_v47, 0.0 }
 0x10f   :  { %v241_v49 = vpop.f32.mrf.mxu0 }
 0x110   :  { %v242_v50 = vadd.f32 %v241_v49, %v1108_v41  ;;  %v305_v52 = vmul.f32 %v1114_v46, %v240_v45  ;;  %vm277_vm3 = vcmp.gt.f32.partialorder %v240_v45, 0.0  ;;  %v320_v2 = vsel %vm276_vm4, %v238_v47, %v304_v55 }
 0x111   :  { %v243_v51 = vpop.f32.mrf.mxu0 }
 0x112   :  { %vm278_vm2 = vcmp.gt.f32.partialorder %v242_v50, 0.0  ;;  %v306_v53 = vmul.f32 %v1117_v48, %v242_v50  ;;  %v244_v54 = vadd.f32 %v243_v51, %v1106_v40  ;;  %v321_v61 = vsel %vm277_vm3, %v240_v45, %v305_v52 }
 0x113   :  { %v247_v56 = vpop.f32.mrf.mxu0 }
 0x114   :  { %v307_v57 = vmul.f32 %v1114_v46, %v244_v54  ;;  %vm279_vm5 = vcmp.gt.f32.partialorder %v244_v54, 0.0  ;;  %v322_v59 = vsel %vm278_vm2, %v242_v50, %v306_v53  ;;  %v248_v63 = vadd.f32 %v247_v56, %v1108_v41  ;;  %v910_v56 = vld [vmem:[#allocation8 + $0x28] sm:$0xff]  }
 0x115   :  { %v249_v58 = vpop.f32.mrf.mxu0  ;;  %v336_v4 = vpack.c.bf16 %v322_v59, %v320_v2  ;;  %844 = vmatprep.subr.bf16.mxu0 %v910_v56 }
 0x116   :  { %v250_v60 = vadd.f32 %v249_v58, %v1106_v40  ;;  %v323_v62 = vsel %vm279_vm5, %v244_v54, %v307_v57  ;;  %v308_v9 = vmul.f32 %v1117_v48, %v248_v63  ;;  %vm280_vm8 = vcmp.gt.f32.partialorder %v248_v63, 0.0  ;;  %845 = vmatpush3.bf16.msra.mxu0 %v910_v56  ;;  %v913_v57 = vld [vmem:[#allocation8 + $0x10] sm:$0xff]   ;;  %v915_v58 = vld [vmem:[#allocation8] sm:$0xff]  }
 0x117   :  { %v251_v0 = vpop.f32.mrf.mxu0  ;;  %v337_v1 = vpack.c.bf16 %v323_v62, %v321_v61 }
 0x118   :  { %v252_v3 = vadd.f32 %v251_v0, %v1108_v41  ;;  %v309_v6 = vmul.f32 %v1114_v46, %v250_v60  ;;  %vm281_vm7 = vcmp.gt.f32.partialorder %v250_v60, 0.0  ;;  %v324_v20 = vsel %vm280_vm8, %v248_v63, %v308_v9 }
 0x119   :  { %v253_v5 = vpop.f32.mrf.mxu0  ;;  %511 = vmatprep.mubr.bf16.mxu1 %v337_v1  ;;  %v778_v1 = vld [vmem:[%s1170_s6] ss:$0 sm:$0xff] }
 0x11a   :  { %vm282_vm6 = vcmp.gt.f32.partialorder %v252_v3, 0.0  ;;  %v310_v7 = vmul.f32 %v1117_v48, %v252_v3  ;;  %v254_v8 = vadd.f32 %v253_v5, %v1106_v40  ;;  %512 = vmatmul.mubr.bf16.vlgmr.msra.gmra.mxu1 %v336_v4  ;;  %v325_v15 = vsel %vm281_vm7, %v250_v60, %v309_v6  ;;  %v761_v60 = vld [vmem:[%s1169_s5] ss:$0 sm:$0xff] }
 0x11b   :  { %v257_v10 = vpop.f32.mrf.mxu0 }
 0x11c   :  { %vm283_vm9 = vcmp.gt.f32.partialorder %v254_v8, 0.0  ;;  %v311_v11 = vmul.f32 %v1114_v46, %v254_v8  ;;  %v326_v13 = vsel %vm282_vm6, %v252_v3, %v310_v7  ;;  %v258_v17 = vadd.f32 %v257_v10, %v1108_v41 }
 0x11d   :  { %v259_v12 = vpop.f32.mrf.mxu0  ;;  %v338_v22 = vpack.c.bf16 %v326_v13, %v324_v20 }
 0x11e   :  { %v260_v14 = vadd.f32 %v259_v12, %v1106_v40  ;;  %v327_v16 = vsel %vm283_vm9, %v254_v8, %v311_v11  ;;  %v312_v27 = vmul.f32 %v1117_v48, %v258_v17  ;;  %vm284_vm12 = vcmp.gt.f32.partialorder %v258_v17, 0.0 }
 0x11f   :  { %v261_v18 = vpop.f32.mrf.mxu0  ;;  %v339_v19 = vpack.c.bf16 %v327_v16, %v325_v15 }
 0x120   :  { %v262_v21 = vadd.f32 %v261_v18, %v1108_v41  ;;  %v313_v24 = vmul.f32 %v1114_v46, %v260_v14  ;;  %vm285_vm11 = vcmp.gt.f32.partialorder %v260_v14, 0.0  ;;  %v328_v38 = vsel %vm284_vm12, %v258_v17, %v312_v27 }
 0x121   :  { %v263_v23 = vpop.f32.mrf.mxu0  ;;  %519 = vmatprep.mubr.bf16.mxu1 %v339_v19 }
 0x122   :  { %vm286_vm10 = vcmp.gt.f32.partialorder %v262_v21, 0.0  ;;  %v314_v25 = vmul.f32 %v1117_v48, %v262_v21  ;;  %v264_v26 = vadd.f32 %v263_v23, %v1106_v40  ;;  %520 = vmatmul.mubr.bf16.gmra.mxu1 %v338_v22  ;;  %v329_v33 = vsel %vm285_vm11, %v260_v14, %v313_v24 }
 0x123   :  { %v267_v28 = vpop.f32.mrf.mxu0 }
 0x124   :  { %vm287_vm13 = vcmp.gt.f32.partialorder %v264_v26, 0.0  ;;  %v315_v29 = vmul.f32 %v1114_v46, %v264_v26  ;;  %v330_v31 = vsel %vm286_vm10, %v262_v21, %v314_v25  ;;  %v268_v35 = vadd.f32 %v267_v28, %v1108_v41 }
 0x125   :  { %v269_v30 = vpop.f32.mrf.mxu0  ;;  %v340_v42 = vpack.c.bf16 %v330_v31, %v328_v38 }
 0x126   :  { %v270_v32 = vadd.f32 %v269_v30, %v1106_v40  ;;  %v331_v34 = vsel %vm287_vm13, %v264_v26, %v315_v29  ;;  %v316_v49 = vmul.f32 %v1117_v48, %v268_v35  ;;  %vm288_vm0 = vcmp.gt.f32.partialorder %v268_v35, 0.0 }
 0x127   :  { %v271_v36 = vpop.f32.mrf.mxu0  ;;  %v341_v37 = vpack.c.bf16 %v331_v34, %v329_v33 }
 0x128   :  { %v272_v39 = vadd.f32 %v271_v36, %v1108_v41  ;;  %v317_v44 = vmul.f32 %v1114_v46, %v270_v32  ;;  %vm289_vm15 = vcmp.gt.f32.partialorder %v270_v32, 0.0  ;;  %v332_v54 = vsel %vm288_vm0, %v268_v35, %v316_v49 }
 0x129   :  { %v273_v43 = vpop.f32.mrf.mxu0  ;;  %527 = vmatprep.mubr.bf16.mxu1 %v341_v37 }
 0x12a   :  { %vm290_vm14 = vcmp.gt.f32.partialorder %v272_v39, 0.0  ;;  %v318_v45 = vmul.f32 %v1117_v48, %v272_v39  ;;  %v274_v47 = vadd.f32 %v273_v43, %v1106_v40  ;;  %528 = vmatmul.mubr.bf16.gmra.mxu1 %v340_v42  ;;  %v333_v41 = vsel %vm289_vm15, %v270_v32, %v317_v44  ;;  %v911_v40 = vld [vmem:[#allocation8 + $0x20] sm:$0xff]   ;;  %v912_v48 = vld [vmem:[#allocation8 + $0x18] sm:$0xff]  }
 0x12b   :  { %846 = vmatprep.subr.bf16.mxu0 %v911_v40 }
 0x12c   :  { %vm291_vm1 = vcmp.gt.f32.partialorder %v274_v47, 0.0  ;;  %v319_v50 = vmul.f32 %v1114_v46, %v274_v47  ;;  %v334_v51 = vsel %vm290_vm14, %v272_v39, %v318_v45  ;;  %847 = vmatpush3.bf16.msra.mxu0 %v911_v40  ;;  %v914_v46 = vld [vmem:[#allocation8 + $0x8] sm:$0xff]  }
 0x12d   :  { %v342_v55 = vpack.c.bf16 %v334_v51, %v332_v54  ;;  %848 = vmatprep.subr.bf16.mxu0 %v912_v48 }
 0x12e   :  { %v335_v52 = vsel %vm291_vm1, %v274_v47, %v319_v50 }
 0x12f   :  { %v343_v53 = vpack.c.bf16 %v335_v52, %v333_v41  ;;  %v779_v52 = vld [vmem:[%s1172_s8] ss:$0 sm:$0xff]  ;;  %s728_s8 = sshll.u32 %s1033_s16, 4  ;;  %s729_s8 = int_to_ptr.vmem [resolvable:$true] %s728_s8 }
 0x130   :  { %849 = vmatpush3.bf16.msra.mxu0 %v912_v48  ;;  %s996_s17 = scalar_lea.vmem %s729_s8, 1024  ;;  %p1001_p7 = scmp.lt.s32.totalorder %s729_s8, %s729_s8 }
 0x131   :  { %535 = vmatprep.mubr.bf16.mxu1 %v343_v53  ;;  %850 = vmatprep.subr.bf16.mxu0 %v913_v57  ;;  %p997_p6 = scmp.ne.s32.totalorder %s729_s8, %s996_s17  ;;  %p1002_p8 = scmp.lt.s32.totalorder %s996_s17, %s996_s17 }
 0x132   :  { %536 = vmatmul.mubr.bf16.gmra.mxu1 %v342_v55 }
 0x133   :  { %p1003_p9 = por %p1002_p8, %p1001_p7 }
 0x134   :  { %851 = vmatpush3.bf16.msra.mxu0 %v913_v57 }
 0x135   :  { %852 = vmatprep.subr.bf16.mxu0 %v914_v46  ;;  %p1004_p10 = pnand %p1003_p9, %p997_p6 }
 0x138   :  { %853 = vmatpush3.bf16.msra.mxu0 %v914_v46 }
 0x139   :  { %854 = vmatprep.subr.bf16.mxu0 %v915_v58 }
 0x13c   :  { %855 = vmatpush3.bf16.msra.mxu0 %v915_v58 }
 0x1da   :  { %v804_v59 = vpop.f32.mrf.mxu1 }
 0x1dc   :  { %v805_v61 = vpop.f32.mrf.mxu1 }
 0x1dd   :  { %v806_v62 = vadd.f32 %v805_v61, %v804_v59 }
 0x1de   :  { %v807_v63 = vpop.f32.mrf.mxu1 }
 0x1df   :  { %v514_v0 = vadd.f32 %v806_v62, %v761_v60 }
 0x1e0   :  { %v808_v2 = vpop.f32.mrf.mxu1 }
 0x1e1   :  { %v809_v3 = vadd.f32 %v808_v2, %v807_v63  ;;  %v559_v5 = vmul.f32 %v778_v1, %v514_v0  ;;  %vm544_vm2 = vcmp.gt.f32.partialorder %v514_v0, 0.0 }
 0x1e2   :  { %v810_v4 = vpop.f32.mrf.mxu1 }
 0x1e3   :  { %v517_v6 = vadd.f32 %v809_v3, %v761_v60  ;;  %v567_v12 = vsel %vm544_vm2, %v514_v0, %v559_v5 }
 0x1e4   :  { %v811_v7 = vpop.f32.mrf.mxu1 }
 0x1e5   :  { %vm545_vm3 = vcmp.gt.f32.partialorder %v517_v6, 0.0  ;;  %v560_v8 = vmul.f32 %v778_v1, %v517_v6  ;;  %v812_v9 = vadd.f32 %v811_v7, %v810_v4 }
 0x1e6   :  { %v813_v10 = vpop.f32.mrf.mxu1 }
 0x1e7   :  { %v522_v11 = vadd.f32 %v812_v9, %v761_v60  ;;  %v568_v13 = vsel %vm545_vm3, %v517_v6, %v560_v8 }
 0x1e8   :  { %v814_v14 = vpop.f32.mrf.mxu1  ;;  %v575_v15 = vpack.c.bf16 %v568_v13, %v567_v12 }
 0x1e9   :  { %v815_v16 = vadd.f32 %v814_v14, %v813_v10  ;;  %v561_v18 = vmul.f32 %v778_v1, %v522_v11  ;;  %vm546_vm4 = vcmp.gt.f32.partialorder %v522_v11, 0.0 }
 0x1ea   :  { %v816_v17 = vpop.f32.mrf.mxu1  ;;  %856 = vmatprep.mubr.bf16.mxu0 %v575_v15 }
 0x1eb   :  { %v525_v19 = vadd.f32 %v815_v16, %v761_v60  ;;  %v569_v24 = vsel %vm546_vm4, %v522_v11, %v561_v18 }
 0x1ec   :  { %v817_v20 = vpop.f32.mrf.mxu1 }
 0x1ed   :  { %vm547_vm5 = vcmp.gt.f32.partialorder %v525_v19, 0.0  ;;  %v562_v21 = vmul.f32 %v778_v1, %v525_v19  ;;  %v818_v22 = vadd.f32 %v817_v20, %v816_v17 }
 0x1ee   :  { %v819_v23 = vpop.f32.mrf.mxu1 }
 0x1ef   :  { %v570_v25 = vsel %vm547_vm5, %v525_v19, %v562_v21  ;;  %v530_v26 = vadd.f32 %v818_v22, %v761_v60 }
 0x1f0   :  { %v576_v27 = vpack.c.bf16 %v570_v25, %v569_v24  ;;  %v820_v28 = vpop.f32.mrf.mxu1 }
 0x1f1   :  { %v821_v29 = vadd.f32 %v820_v28, %v819_v23  ;;  %v563_v31 = vmul.f32 %v778_v1, %v530_v26  ;;  %vm548_vm6 = vcmp.gt.f32.partialorder %v530_v26, 0.0 }
 0x1f2   :  { %v822_v30 = vpop.f32.mrf.mxu1  ;;  %857 = vmatmul.mubr.bf16.vlgmr.msra.gmra.mxu0 %v576_v27 }
 0x1f3   :  { %v533_v32 = vadd.f32 %v821_v29, %v761_v60  ;;  %v571_v38 = vsel %vm548_vm6, %v530_v26, %v563_v31 }
 0x1f4   :  { %v823_v33 = vpop.f32.mrf.mxu1 }
 0x1f5   :  { %vm549_vm7 = vcmp.gt.f32.partialorder %v533_v32, 0.0  ;;  %v564_v34 = vmul.f32 %v778_v1, %v533_v32  ;;  %v824_v35 = vadd.f32 %v823_v33, %v822_v30 }
 0x1f6   :  { %v825_v36 = vpop.f32.mrf.mxu1 }
 0x1f7   :  { %v538_v37 = vadd.f32 %v824_v35, %v761_v60  ;;  %v572_v39 = vsel %vm549_vm7, %v533_v32, %v564_v34 }
 0x1f8   :  { %v826_v42 = vpop.f32.mrf.mxu1  ;;  %v577_v43 = vpack.c.bf16 %v572_v39, %v571_v38 }
 0x1f9   :  { %v827_v44 = vadd.f32 %v826_v42, %v825_v36  ;;  %v565_v45 = vmul.f32 %v778_v1, %v538_v37  ;;  %vm550_vm8 = vcmp.gt.f32.partialorder %v538_v37, 0.0 }
 0x1fa   :  { %860 = vmatprep.mubr.bf16.mxu0 %v577_v43 }
 0x1fb   :  { %v541_v47 = vadd.f32 %v827_v44, %v761_v60  ;;  %v573_v50 = vsel %vm550_vm8, %v538_v37, %v565_v45 }
 0x1fd   :  { %vm551_vm9 = vcmp.gt.f32.partialorder %v541_v47, 0.0  ;;  %v566_v49 = vmul.f32 %v778_v1, %v541_v47 }
 0x1ff   :  { %v574_v51 = vsel %vm551_vm9, %v541_v47, %v566_v49 }
 0x200   :  { %v578_v41 = vpack.c.bf16 %v574_v51, %v573_v50 }
 0x202   :  { %861 = vmatmul.mubr.bf16.gmra.mxu0 %v578_v41 }
 0x2b2   :  { %v858_v53 = vpop.f32.mrf.mxu0 }
 0x2b3   :  { %v693_v54 = vadd.f32 %v858_v53, %v779_v52 }
 0x2b4   :  { %v684_v55 = vpop.f32.mrf.mxu0 }
 0x2b5   :  { %717 = vst [vmem:[#allocation10 + $0x10] sm:$0xff] %v693_v54  ;;  %v685_v56 = vadd.f32 %v779_v52, %v684_v55 }
 0x2b6   :  { %v859_v40 = vpop.f32.mrf.mxu0 }
 0x2b7   :  { %715 = vst [vmem:[#allocation10] sm:$0xff] %v685_v56  ;;  %v696_v48 = vadd.f32 %v859_v40, %v779_v52 }
 0x2b8   :  { %v687_v57 = vpop.f32.mrf.mxu0 }
 0x2b9   :  { %718 = vst [vmem:[#allocation10 + $0x18] sm:$0xff] %v696_v48  ;;  %v688_v46 = vadd.f32 %v779_v52, %v687_v57 }
 0x2bb   :  { %716 = vst [vmem:[#allocation10 + $0x8] sm:$0xff] %v688_v46 }
 0x2c2   :  { %v862_v58 = vpop.f32.mrf.mxu0 }
 0x2c3   :  { %v709_v59 = vadd.f32 %v862_v58, %v779_v52 }
 0x2c4   :  { %v700_v60 = vpop.f32.mrf.mxu0 }
 0x2c5   :  { %721 = vst [vmem:[#allocation10 + $0x30] sm:$0xff] %v709_v59  ;;  %v701_v61 = vadd.f32 %v779_v52, %v700_v60 }
 0x2c6   :  { %v863_v62 = vpop.f32.mrf.mxu0 }
 0x2c7   :  { %719 = vst [vmem:[#allocation10 + $0x20] sm:$0xff] %v701_v61  ;;  %v712_v63 = vadd.f32 %v863_v62, %v779_v52 }
 0x2c8   :  { %v703_v0 = vpop.f32.mrf.mxu0 }
 0x2c9   :  { %722 = vst [vmem:[#allocation10 + $0x38] sm:$0xff] %v712_v63  ;;  %v704_v1 = vadd.f32 %v779_v52, %v703_v0 }
 0x2cb   :  { %720 = vst [vmem:[#allocation10 + $0x28] sm:$0xff] %v704_v1 }
 0x2cc   :  { %1007 = shalt.err (!%p1004_p10)
}
 0x2cd   :  { %734 = dma.vmem_to_hbm [thread:$0]  %s729_s8, 1024, %s1173_s9, [#allocation4], %s1025_s12, %s1025_s12, %s1026_s13  }
 0x2ce   :  { %1022 = dma.done.wait [#allocation4], 1024  }
 0x2cf   :  { %1023 = vsyncadd [#allocation4], 4294966272 }
 0x2d0   :  { %738 = vsyncpa [#allocation3], 1 }
 0x2d1   :  { %739 = vsyncpa [#allocation6], 1 }
 0x2d2   :  { %740 = vsyncpa [#allocation9], 1 }
 0x2d3   :  { %741 = vsyncpa [#allocation4], 1 }

</bundles_post_ra>
